<compile_context>
chip_gen: v6e
topology: v6e:2x2x1
jax: 0.10.0
libtpu: 0.0.40
codegen_flags: <defaults>
</compile_context>

<pallas_src>
import functools

import jax
import jax.numpy as jnp
from jax.experimental import pallas as pl
from jax.experimental.pallas import tpu as pltpu

_SUBLANES = 8
# Per-input-buffer budget measured in f32-intermediate bytes (4 B/elem), not input
# itemsize: in-kernel temporaries are f32 regardless of the wire dtype.
_VMEM_TILE_BUDGET_F32_BYTES = 2 * 1024 * 1024


def _row_align(itemsize: int) -> int:
    """Rows per native sublane tile for this dtype (8 for f32, 16 for bf16, 32 for i8)."""
    return _SUBLANES * max(1, 4 // max(1, itemsize))


def _vmem_limit_bytes() -> int:
    """Generation-aware scoped-VMEM limit (48 MiB on v5e/v6e, ~38 MiB on v7x)."""
    cap = 64 * 1024 * 1024  # conservative fallback: assume v7x-sized physical VMEM
    try:
        cap = pltpu.get_tpu_info().vmem_capacity_bytes
    except Exception:
        pass
    return min(48 * 1024 * 1024, (cap * 3) // 5)


def _pick_tile_n(n: int, c: int, itemsize: int) -> int:
    """Largest aligned row tile whose f32 intermediate footprint fits the budget."""
    align = _row_align(itemsize)
    t = _VMEM_TILE_BUDGET_F32_BYTES // max(1, c * 4)
    t = max(align, (t // align) * align)
    n_pad = pl.cdiv(n, align) * align
    return min(t, n_pad)


def _label_smoothing_kernel(x_ref, g_ref, out_ref, *, smoothing: float):
    # x_ref:   (TILE_N, C) logits tile, input dtype (bf16 stays bf16 on the wire), VMEM
    # g_ref:   (TILE_N, 1) f32 target logits (gathered in the wrapper), VMEM
    # out_ref: (TILE_N, 1) f32 per-row losses, VMEM
    x = x_ref[...]                                                 # input dtype
    c = x.shape[-1]

    # max / subtract in the input dtype; single widen to f32 for exp + accumulation.
    m = jnp.max(x, axis=-1, keepdims=True)                         # (TILE_N, 1)
    shifted = (x - m).astype(jnp.float32)                          # (TILE_N, C) f32
    sum_exp = jnp.sum(jnp.exp(shifted), axis=-1, keepdims=True)    # (TILE_N, 1)
    sum_shift = jnp.sum(shifted, axis=-1, keepdims=True)           # (TILE_N, 1)

    m32 = m.astype(jnp.float32)
    lse = m32 + jnp.log(sum_exp)                                   # logsumexp per row
    sum_x = sum_shift + c * m32                                    # sum of logits per row

    # loss_row = (1-s)*nll + s*smooth = lse - (1-s)*x[target] - (s/C)*sum(x)
    out_ref[...] = lse - (1.0 - smoothing) * g_ref[...] - (smoothing / c) * sum_x


def label_smoothing_loss(
    x: jax.Array, target: jax.Array, smoothing: float = 0.0, *, tile_n: int | None = None
) -> jax.Array:
    """x: (N, C) float logits; target: (N,) int labels. Returns scalar float32 loss."""
    n, c = x.shape
    itemsize = jnp.dtype(x.dtype).itemsize
    align = _row_align(itemsize)
    if tile_n is None:
        tile_n = _pick_tile_n(n, c, itemsize)
    assert tile_n % align == 0, (tile_n, align)
    num_blocks = pl.cdiv(n, tile_n)

    # O(N) gather on the XLA side: removes the per-element iota/one-hot work the kernel
    # used to do. Cast to f32 so the kernel's (1-s)*g term needs no further widening.
    tgt = target.astype(jnp.int32).reshape(n, 1)
    g = jnp.take_along_axis(x, tgt, axis=-1).astype(jnp.float32)   # (N, 1)

    kernel = functools.partial(_label_smoothing_kernel, smoothing=float(smoothing))
    losses = pl.pallas_call(
        kernel,
        out_shape=jax.ShapeDtypeStruct((num_blocks * tile_n, 1), jnp.float32),
        grid=(num_blocks,),
        in_specs=[
            pl.BlockSpec((tile_n, c), lambda i: (i, 0)),   # logits tile (input dtype)
            pl.BlockSpec((tile_n, 1), lambda i: (i, 0)),   # gathered target logits
        ],
        out_specs=pl.BlockSpec((tile_n, 1), lambda i: (i, 0)),
        compiler_params=pltpu.CompilerParams(
            dimension_semantics=("parallel",),             # lets multi-TC chips shard blocks
            vmem_limit_bytes=_vmem_limit_bytes(),
        ),
    )(x, g)

    # Padded rows of the last tile land past row n; slice them off before the mean.
    return jnp.sum(losses[:n, 0]) / n


class LabelSmoothing:
    """NLL loss with label smoothing (JAX/Pallas port of the PyTorch module)."""

    def __init__(self, smoothing: float = 0.0):
        self.smoothing = smoothing

    def __call__(self, x: jax.Array, target: jax.Array) -> jax.Array:
        return label_smoothing_loss(x, target, self.smoothing)


def _reference(x, target, smoothing):
    logprobs = jax.nn.log_softmax(x.astype(jnp.float32), axis=-1)
    nll = -jnp.take_along_axis(logprobs, target[:, None].astype(jnp.int32), axis=-1)[:, 0]
    smooth = -jnp.mean(logprobs, axis=-1)
    return jnp.mean((1.0 - smoothing) * nll + smoothing * smooth)


if __name__ == "__main__":
    key = jax.random.PRNGKey(0)
    smoothing = 0.1
    k1x, k1t, k2x, k2t, k3x, k3t = jax.random.split(key, 6)

    # Test 1: small single-block f32 case (auto tile).
    N1, C1 = 8, 32
    x1 = jax.random.normal(k1x, (N1, C1), dtype=jnp.float32)
    t1 = jax.random.randint(k1t, (N1,), 0, C1, dtype=jnp.int32)
    module = LabelSmoothing(smoothing)
    loss1 = jax.block_until_ready(module(x1, t1))
    ref1 = _reference(x1, t1, smoothing)
    assert jnp.allclose(loss1, ref1, atol=1e-4, rtol=1e-4), (loss1, ref1)

    # Test 2: multi-block f32 grid with a partial (sliced-off) last tile.
    N2, C2 = 20, 32
    x2 = jax.random.normal(k2x, (N2, C2), dtype=jnp.float32)
    t2 = jax.random.randint(k2t, (N2,), 0, C2, dtype=jnp.int32)
    loss2 = jax.block_until_ready(label_smoothing_loss(x2, t2, smoothing, tile_n=8))
    ref2 = _reference(x2, t2, smoothing)
    assert jnp.allclose(loss2, ref2, atol=1e-4, rtol=1e-4), (loss2, ref2)

    # Test 3: bf16 logits, 16-row tiles (bf16 sublane packing), partial last tile.
    N3, C3 = 24, 32
    x3 = jax.random.normal(k3x, (N3, C3), dtype=jnp.float32).astype(jnp.bfloat16)
    t3 = jax.random.randint(k3t, (N3,), 0, C3, dtype=jnp.int32)
    loss3 = jax.block_until_ready(label_smoothing_loss(x3, t3, smoothing, tile_n=16))
    ref3 = _reference(x3, t3, smoothing)
    assert jnp.allclose(loss3, ref3, atol=2e-2, rtol=2e-2), (loss3, ref3)

    print("KERNEL_OK")
</pallas_src>

<mosaic_0001>
module attributes {stable_mosaic.version = 11 : i64} {
  func.func @_label_smoothing_kernel(%arg0: i32, %arg1: memref<8x32xf32, #tpu.memory_space<vmem>>, %arg2: memref<8x1xf32, #tpu.memory_space<vmem>>, %arg3: memref<8x1xf32, #tpu.memory_space<vmem>>) attributes {dimension_semantics = [#tpu.dimension_semantics<parallel>], iteration_bounds = array<i64: 1>, scalar_prefetch = 0 : i64, scratch_operands = 0 : i64, tpu.core_type = #tpu.core_type<tc>, window_params = [{transform_indices = @transform_0, window_bounds = array<i64: 8, 32>}, {transform_indices = @transform_1, window_bounds = array<i64: 8, 1>}, {transform_indices = @transform_2, window_bounds = array<i64: 8, 1>}]} {
    %c0 = arith.constant 0 : index
    %c0_0 = arith.constant 0 : index
    %0 = vector.load %arg1[%c0, %c0_0] : memref<8x32xf32, #tpu.memory_space<vmem>>, vector<8x32xf32>
    %cst = arith.constant dense<0xFF800000> : vector<8xf32>
    %1 = vector.multi_reduction <maximumf>, %0, %cst [1] : vector<8x32xf32> to vector<8xf32>
    %2 = vector.shape_cast %1 : vector<8xf32> to vector<8x1xf32>
    %3 = vector.broadcast %2 : vector<8x1xf32> to vector<8x32xf32>
    %4 = arith.subf %0, %3 : vector<8x32xf32>
    %5 = math.exp %4 : vector<8x32xf32>
    %cst_1 = arith.constant dense<0.000000e+00> : vector<8xf32>
    %6 = vector.multi_reduction <add>, %5, %cst_1 [1] : vector<8x32xf32> to vector<8xf32>
    %7 = vector.shape_cast %6 : vector<8xf32> to vector<8x1xf32>
    %cst_2 = arith.constant dense<0.000000e+00> : vector<8xf32>
    %8 = vector.multi_reduction <add>, %4, %cst_2 [1] : vector<8x32xf32> to vector<8xf32>
    %9 = vector.shape_cast %8 : vector<8xf32> to vector<8x1xf32>
    %10 = math.log %7 : vector<8x1xf32>
    %11 = arith.addf %2, %10 : vector<8x1xf32>
    %cst_3 = arith.constant 3.200000e+01 : f32
    %12 = vector.broadcast %cst_3 : f32 to vector<8x1xf32>
    %13 = arith.mulf %12, %2 : vector<8x1xf32>
    %14 = arith.addf %9, %13 : vector<8x1xf32>
    %c0_4 = arith.constant 0 : index
    %c0_5 = arith.constant 0 : index
    %15 = vector.load %arg2[%c0_4, %c0_5] : memref<8x1xf32, #tpu.memory_space<vmem>>, vector<8x1xf32>
    %cst_6 = arith.constant 0.899999976 : f32
    %16 = vector.broadcast %cst_6 : f32 to vector<8x1xf32>
    %17 = arith.mulf %16, %15 : vector<8x1xf32>
    %18 = arith.subf %11, %17 : vector<8x1xf32>
    %cst_7 = arith.constant 3.125000e-03 : f32
    %19 = vector.broadcast %cst_7 : f32 to vector<8x1xf32>
    %20 = arith.mulf %19, %14 : vector<8x1xf32>
    %21 = arith.subf %18, %20 : vector<8x1xf32>
    %c0_8 = arith.constant 0 : index
    %c0_9 = arith.constant 0 : index
    %22 = vector.load %arg3[%c0_8, %c0_9] : memref<8x1xf32, #tpu.memory_space<vmem>>, vector<8x1xf32>
    tpu.vector_store %arg3[%c0_8, %c0_9], %21 {strides = array<i32>} : memref<8x1xf32, #tpu.memory_space<vmem>>, vector<8x1xf32>,
    return
  }
  func.func @transform_0(%arg0: i32) -> (i32, i32) {
    %c0_i32 = arith.constant 0 : i32
    %c0_i32_0 = arith.constant 0 : i32
    return %arg0, %c0_i32 : i32, i32
  }
  func.func @transform_1(%arg0: i32) -> (i32, i32) {
    %c0_i32 = arith.constant 0 : i32
    %c0_i32_0 = arith.constant 0 : i32
    return %arg0, %c0_i32 : i32, i32
  }
  func.func @transform_2(%arg0: i32) -> (i32, i32) {
    %c0_i32 = arith.constant 0 : i32
    %c0_i32_0 = arith.constant 0 : i32
    return %arg0, %c0_i32 : i32, i32
  }
}

</mosaic_0001>

<bundles_post_ra>
// kernel: tpu_custom_call.1
= control target key start
LH: loop header
LB: loop body
LE: loop exit
PB: predicated region body
PF: predicated region fallthrough
CT: control target
= control target key end

     0   :  { %vm12_vm0 = vcmask 261120   ;;  %vm35_vm1 = vcmask 7168   ;;  %s69_s0 = inlined_call_operand.vmem [shape: f32[8,32], index: 0, kind: input, shape index: {}]   ;;  %s70_s1 = inlined_call_operand.vmem [shape: f32[8,1], index: 1, kind: input, shape index: {}]   ;;  %s71_s2 = inlined_call_operand.vmem [shape: f32[8,1], index: 2, kind: output, shape index: {}]  }
   0x1   :  { %v11_v0 = vld [vmem:[%s69_s0] sm:$0xff] }
   0x2   :  { %v13_v1 = vsel %vm12_vm0, %v11_v0, -inf  ;;  %v30_v10 = vld [vmem:[%s70_s1] sm:$0xff] }
   0x3   :  { %14 = vmax.xlane.f32.xlu0 %v13_v1  ;;  %v31_v14 = vmul.f32 0.9, %v30_v10 }
  0x8c   :  { %v15_v2 = vpop.xlane.xlu0 %14 }
  0x8d   :  { %v16_v3 = vsub.f32 %v11_v0, %v15_v2  ;;  %v28_v11 = vmul.f32 32.0, %v15_v2 }
  0x8f   :  { %v22_v4 = vsel %vm12_vm0, %v16_v3, 0.0  ;;  %v17_v5 = vmul.f32 1.442695, %v16_v3 }
  0x90   :  { %23 = vadd.xlane.f32.xlu1 %v22_v4 }
  0x91   :  { %41 = vpow2.f32 %v17_v5 }
  0x9e   :  { %v42_v6 = vpop.eup %41 }
  0x9f   :  { %v19_v7 = vsel %vm12_vm0, %v42_v6, 0.0 }
  0xa0   :  { %20 = vadd.xlane.f32.xlu0 %v19_v7 }
 0x119   :  { %v24_v9 = vpop.xlane.xlu1 %23 }
 0x11a   :  { %v29_v13 = vadd.f32 %v28_v11, %v24_v9 }
 0x11c   :  { %v33_v17 = vmul.f32 0.003125, %v29_v13 }
 0x129   :  { %v21_v8 = vpop.xlane.xlu0 %20 }
 0x12a   :  { %43 = vlog2.f32 %v21_v8 }
 0x137   :  { %v44_v12 = vpop.eup %43 }
 0x138   :  { %v26_v15 = vmul.f32 0.6931472, %v44_v12 }
 0x13a   :  { %v27_v16 = vadd.f32 %v26_v15, %v15_v2 }
 0x13c   :  { %v32_v18 = vsub.f32 %v27_v16, %v31_v14 }
 0x13e   :  { %v34_v19 = vsub.f32 %v32_v18, %v33_v17 }
 0x140   :  { %36 = vst.msk [vmem:[%s71_s2] sm:$0xff] %vm35_vm1, %v34_v19 }

</bundles_post_ra>
